<compile_context>
chip_gen: v7x
topology: tpu7x:2x2x1
jax: 0.10.0
libtpu: 0.0.40
codegen_flags: <defaults>
</compile_context>

<pallas_src>
import jax
import jax.numpy as jnp
import numpy as np
from jax.experimental import pallas as pl
from jax.experimental.pallas import tpu as pltpu


def _self_gating_kernel(x_k_ref, w_ref, b_ref, x_n_ref, o_ref, acc_ref):
    """One (tm, tn) output tile; accumulates over the K grid axis.

    x_k_ref: (tm, tk)  K-slice of x rows (matmul LHS)
    w_ref:   (tk, tn)  slice of W^T (matmul RHS)
    b_ref:   (1, tn)   bias slice
    x_n_ref: (tm, tn)  N-slice of the same x rows (for the elementwise gate)
    o_ref:   (tm, tn)  output tile
    acc_ref: (tm, tn)  float32 accumulator scratch
    """
    k = pl.program_id(2)

    @pl.when(k == 0)
    def _():
        acc_ref[...] = jnp.zeros_like(acc_ref)

    acc_ref[...] += jnp.dot(
        x_k_ref[...], w_ref[...], preferred_element_type=jnp.float32
    )

    @pl.when(k == pl.num_programs(2) - 1)
    def _():
        logits = acc_ref[...] + b_ref[...].astype(jnp.float32)
        gate = jax.nn.sigmoid(logits)
        o_ref[...] = (x_n_ref[...].astype(jnp.float32) * gate).astype(o_ref.dtype)


def _pick_tile(dim, candidates):
    for c in candidates:
        if dim % c == 0:
            return c
    return dim  # full extent (always legal for BlockSpec)


def self_gating_forward(x, weight, bias, *, tm=None, tn=None, tk=None):
    """SelfGating forward.

    x:      (B, S, D) activations.
    weight: (D, D) PyTorch nn.Linear layout (out_features, in_features).
    bias:   (D,)
    Returns (B, S, D) = x * sigmoid(x @ weight.T + bias).
    """
    B, S, D = x.shape
    M = B * S
    x2 = x.reshape(M, D)
    wt = weight.T.astype(x.dtype)       # (D_in, D_out) for row-major matmul
    b2 = bias.reshape(1, D)

    # Tile selection: keep lane dim a multiple of 128 when D allows it, row
    # tiles a multiple of 8; fall back to full-extent blocks for tiny shapes.
    if tm is None:
        tm = _pick_tile(M, (512, 256, 128, 64, 32, 16, 8))
    if tn is None:
        tn = _pick_tile(D, (512, 256, 128))
    if tk is None:
        tk = _pick_tile(D, (512, 256, 128))

    grid = (M // tm, D // tn, D // tk)

    out2 = pl.pallas_call(
        _self_gating_kernel,
        out_shape=jax.ShapeDtypeStruct((M, D), x.dtype),
        grid=grid,
        in_specs=[
            pl.BlockSpec((tm, tk), lambda i, j, k: (i, k)),   # x rows, K slice
            pl.BlockSpec((tk, tn), lambda i, j, k: (k, j)),   # W^T tile
            pl.BlockSpec((1, tn), lambda i, j, k: (0, j)),    # bias slice
            pl.BlockSpec((tm, tn), lambda i, j, k: (i, j)),   # x rows, N slice
        ],
        out_specs=pl.BlockSpec((tm, tn), lambda i, j, k: (i, j)),
        scratch_shapes=[pltpu.VMEM((tm, tn), jnp.float32)],
        compiler_params=pltpu.CompilerParams(
            dimension_semantics=("parallel", "parallel", "arbitrary"),
        ),
    )(x2, wt, b2, x2)

    return out2.reshape(B, S, D)


if __name__ == "__main__":
    # Small shapes consistent with the module: (batch, seq_len, d_model)
    B, S, D = 2, 8, 32

    key = jax.random.PRNGKey(0)
    kx, kw, kb = jax.random.split(key, 3)
    x = jax.random.normal(kx, (B, S, D), dtype=jnp.float32)
    # nn.Linear(d_model, d_model) parameters in PyTorch layout (out, in).
    weight = jax.random.normal(kw, (D, D), dtype=jnp.float32) * (1.0 / np.sqrt(D))
    bias = jax.random.normal(kb, (D,), dtype=jnp.float32) * 0.1

    out = self_gating_forward(x, weight, bias)
    out = jax.block_until_ready(out)

    # Reference (plain JAX, same semantics as the PyTorch forward).
    ref = x * jax.nn.sigmoid(jnp.einsum("bsd,ed->bse", x, weight) + bias)
    np.testing.assert_allclose(np.asarray(out), np.asarray(ref), rtol=1e-5, atol=1e-5)

    print("KERNEL_OK")
</pallas_src>

<mosaic_0001>
module attributes {stable_mosaic.version = 11 : i64} {
  func.func @_self_gating_kernel(%arg0: i32, %arg1: i32, %arg2: i32, %arg3: memref<16x32xf32, #tpu.memory_space<vmem>>, %arg4: memref<32x32xf32, #tpu.memory_space<vmem>>, %arg5: memref<1x32xf32, #tpu.memory_space<vmem>>, %arg6: memref<16x32xf32, #tpu.memory_space<vmem>>, %arg7: memref<16x32xf32, #tpu.memory_space<vmem>>, %arg8: memref<16x32xf32, #tpu.memory_space<vmem>>) attributes {dimension_semantics = [#tpu.dimension_semantics<parallel>, #tpu.dimension_semantics<parallel>, #tpu.dimension_semantics<arbitrary>], iteration_bounds = array<i64: 1, 1, 1>, scalar_prefetch = 0 : i64, scratch_operands = 1 : i64, tpu.core_type = #tpu.core_type<tc>, window_params = [{transform_indices = @transform_0, window_bounds = array<i64: 16, 32>}, {transform_indices = @transform_1, window_bounds = array<i64: 32, 32>}, {transform_indices = @transform_2, window_bounds = array<i64: 1, 32>}, {transform_indices = @transform_3, window_bounds = array<i64: 16, 32>}, {transform_indices = @transform_4, window_bounds = array<i64: 16, 32>}]} {
    %c0_i32 = arith.constant 0 : i32
    %0 = arith.cmpi eq, %arg2, %c0_i32 : i32
    %1 = arith.extui %0 : i1 to i32
    %c0_i32_0 = arith.constant 0 : i32
    %2 = arith.cmpi ne, %1, %c0_i32_0 : i32
    scf.if %2 {
      %cst_10 = arith.constant 0.000000e+00 : f32
      %12 = vector.broadcast %cst_10 : f32 to vector<16x32xf32>
      %c0_11 = arith.constant 0 : index
      %c0_12 = arith.constant 0 : index
      %13 = vector.load %arg8[%c0_11, %c0_12] : memref<16x32xf32, #tpu.memory_space<vmem>>, vector<16x32xf32>
      tpu.vector_store %arg8[%c0_11, %c0_12], %12 {strides = array<i32>} : memref<16x32xf32, #tpu.memory_space<vmem>>, vector<16x32xf32>,
    } else {
    }
    %c0 = arith.constant 0 : index
    %c0_1 = arith.constant 0 : index
    %3 = vector.load %arg8[%c0, %c0_1] : memref<16x32xf32, #tpu.memory_space<vmem>>, vector<16x32xf32>
    %c0_2 = arith.constant 0 : index
    %c0_3 = arith.constant 0 : index
    %4 = vector.load %arg3[%c0_2, %c0_3] : memref<16x32xf32, #tpu.memory_space<vmem>>, vector<16x32xf32>
    %c0_4 = arith.constant 0 : index
    %c0_5 = arith.constant 0 : index
    %5 = vector.load %arg4[%c0_4, %c0_5] : memref<32x32xf32, #tpu.memory_space<vmem>>, vector<32x32xf32>
    %cst = arith.constant dense<0.000000e+00> : vector<16x32xf32>
    %6 = tpu.matmul %4, %5, %cst {dimension_numbers = #tpu.dot_dimension_numbers<[1], [0], [0], [1], [0, 0, 1, 1], [], []>} : vector<16x32xf32>, vector<32x32xf32>, vector<16x32xf32> -> vector<16x32xf32>
    %7 = arith.addf %3, %6 : vector<16x32xf32>
    %c0_6 = arith.constant 0 : index
    %c0_7 = arith.constant 0 : index
    %8 = vector.load %arg8[%c0_6, %c0_7] : memref<16x32xf32, #tpu.memory_space<vmem>>, vector<16x32xf32>
    tpu.vector_store %arg8[%c0_6, %c0_7], %7 {strides = array<i32>} : memref<16x32xf32, #tpu.memory_space<vmem>>, vector<16x32xf32>,
    %c0_i32_8 = arith.constant 0 : i32
    %9 = arith.cmpi eq, %arg2, %c0_i32_8 : i32
    %10 = arith.extui %9 : i1 to i32
    %c0_i32_9 = arith.constant 0 : i32
    %11 = arith.cmpi ne, %10, %c0_i32_9 : i32
    scf.if %11 {
      %c0_10 = arith.constant 0 : index
      %c0_11 = arith.constant 0 : index
      %12 = vector.load %arg8[%c0_10, %c0_11] : memref<16x32xf32, #tpu.memory_space<vmem>>, vector<16x32xf32>
      %c0_12 = arith.constant 0 : index
      %c0_13 = arith.constant 0 : index
      %13 = vector.load %arg5[%c0_12, %c0_13] : memref<1x32xf32, #tpu.memory_space<vmem>>, vector<1x32xf32>
      %14 = vector.broadcast %13 : vector<1x32xf32> to vector<16x32xf32>
      %15 = arith.addf %12, %14 : vector<16x32xf32>
      %16 = arith.negf %15 : vector<16x32xf32>
      %17 = math.exp %16 : vector<16x32xf32>
      %cst_14 = arith.constant 1.000000e+00 : f32
      %18 = vector.broadcast %cst_14 : f32 to vector<16x32xf32>
      %19 = arith.addf %18, %17 : vector<16x32xf32>
      %20 = arith.divf %18, %19 : vector<16x32xf32>
      %c0_15 = arith.constant 0 : index
      %c0_16 = arith.constant 0 : index
      %21 = vector.load %arg6[%c0_15, %c0_16] : memref<16x32xf32, #tpu.memory_space<vmem>>, vector<16x32xf32>
      %22 = arith.mulf %21, %20 : vector<16x32xf32>
      %c0_17 = arith.constant 0 : index
      %c0_18 = arith.constant 0 : index
      %23 = vector.load %arg7[%c0_17, %c0_18] : memref<16x32xf32, #tpu.memory_space<vmem>>, vector<16x32xf32>
      tpu.vector_store %arg7[%c0_17, %c0_18], %22 {strides = array<i32>} : memref<16x32xf32, #tpu.memory_space<vmem>>, vector<16x32xf32>,
    } else {
    }
    return
  }
  func.func @transform_0(%arg0: i32, %arg1: i32, %arg2: i32) -> (i32, i32) {
    %c0_i32 = arith.constant 0 : i32
    return %arg0, %arg2 : i32, i32
  }
  func.func @transform_1(%arg0: i32, %arg1: i32, %arg2: i32) -> (i32, i32) {
    %c0_i32 = arith.constant 0 : i32
    return %arg2, %arg1 : i32, i32
  }
  func.func @transform_2(%arg0: i32, %arg1: i32, %arg2: i32) -> (i32, i32) {
    %c0_i32 = arith.constant 0 : i32
    %c0_i32_0 = arith.constant 0 : i32
    return %c0_i32, %arg1 : i32, i32
  }
  func.func @transform_3(%arg0: i32, %arg1: i32, %arg2: i32) -> (i32, i32) {
    %c0_i32 = arith.constant 0 : i32
    return %arg0, %arg1 : i32, i32
  }
  func.func @transform_4(%arg0: i32, %arg1: i32, %arg2: i32) -> (i32, i32) {
    %c0_i32 = arith.constant 0 : i32
    return %arg0, %arg1 : i32, i32
  }
}

</mosaic_0001>

<bundles_post_ra>
// kernel: tpu_custom_call.1
= control target key start
LH: loop header
LB: loop body
LE: loop exit
PB: predicated region body
PF: predicated region fallthrough
CT: control target
= control target key end

     0   :  { %9 = vsyncpa [#allocation4], 0  ;;  %s459_s0 = inlined_call_operand.hbm [shape: f32[16,32], index: 0, kind: input, shape index: {}]   ;;  %s460_s1 = inlined_call_operand.hbm [shape: f32[32,32], index: 1, kind: input, shape index: {}]   ;;  %s461_s2 = inlined_call_operand.vmem [shape: f32[1,32], index: 2, kind: input, shape index: {}]   ;;  %s462_s3 = inlined_call_operand.hbm [shape: f32[16,32], index: 3, kind: input, shape index: {}]   ;;  %s463_s4 = inlined_call_operand.hbm [shape: f32[16,32], index: 4, kind: output, shape index: {}]  }
   0x1   :  { %10 = vsyncpa [#allocation7], 0 }
   0x2   :  { %11 = vsyncpa [#allocation5], 0  ;;  %s349_s15 = smov [#allocation6]   ;;  %s350_s17 = smov [#allocation3]  }
   0x3   :  { %s29_s16 = sshll.u32 %s349_s15, 4  ;;  %s17_s18 = sshll.u32 %s350_s17, 4  ;;  %s30_s16 = int_to_ptr.vmem [resolvable:$true] %s29_s16  ;;  %s381_s18 = int_to_ptr.vmem [resolvable:$true] %s17_s18 }
   0x4   :  { %s255_s21 = scalar_lea.hbm %s460_s1, 512 }
   0x5   :  { %p256_p0 = scmp.ne.s32.totalorder %s460_s1, %s255_s21  ;;  %p259_p1 = scmp.lt.u32.totalorder %s255_s21, %s460_s1 }
   0x7   :  { %p261_p2 = pnand %p259_p1, %p256_p0 }
   0x9   :  { %264 = shalt.err (!%p261_p2)
}
   0xa   :  { %s265_s26 = scalar_lea.vmem %s30_s16, 512  ;;  %p270_p4 = scmp.lt.s32.totalorder %s30_s16, %s30_s16 }
   0xb   :  { %p266_p3 = scmp.ne.s32.totalorder %s30_s16, %s265_s26  ;;  %p271_p5 = scmp.lt.s32.totalorder %s265_s26, %s265_s26 }
   0xd   :  { %p272_p6 = por %p271_p5, %p270_p4 }
   0xf   :  { %p273_p7 = pnand %p272_p6, %p266_p3 }
  0x11   :  { %276 = shalt.err (!%p273_p7)
}
  0x12   :  { %s351_s27 = smov 128   ;;  %s352_s28 = smov 8  }
  0x13   :  { %35 = dma.hbm_to_vmem [thread:$0]  %s460_s1, 512, %s30_s16, [#allocation7], %s351_s27, %s351_s27, %s352_s28  }
  0x14   :  { %s277_s7 = scalar_lea.hbm %s459_s0, 256 }
  0x15   :  { %p278_p8 = scmp.ne.s32.totalorder %s459_s0, %s277_s7  ;;  %p281_p9 = scmp.lt.u32.totalorder %s277_s7, %s459_s0 }
  0x17   :  { %p283_p10 = pnand %p281_p9, %p278_p8 }
  0x19   :  { %286 = shalt.err (!%p283_p10)
}
  0x1a   :  { %s287_s12 = scalar_lea.vmem %s381_s18, 256  ;;  %p292_p12 = scmp.lt.s32.totalorder %s381_s18, %s381_s18 }
  0x1b   :  { %p288_p11 = scmp.ne.s32.totalorder %s381_s18, %s287_s12  ;;  %p293_p13 = scmp.lt.s32.totalorder %s287_s12, %s287_s12 }
  0x1d   :  { %p294_p0 = por %p293_p13, %p292_p12 }
  0x1f   :  { %p295_p1 = pnand %p294_p0, %p288_p11 }
  0x21   :  { %298 = shalt.err (!%p295_p1)
}
  0x22   :  { %23 = dma.hbm_to_vmem [thread:$0]  %s459_s0, 256, %s381_s18, [#allocation4], %s351_s27, %s351_s27, %s352_s28  }
  0x23   :  { %s353_s14 = smov [#allocation8]   ;;  %s299_s19 = scalar_lea.hbm %s462_s3, 256 }
  0x24   :  { %s43_s15 = sshll.u32 %s353_s14, 4  ;;  %p300_p2 = scmp.ne.s32.totalorder %s462_s3, %s299_s19  ;;  %s44_s15 = int_to_ptr.vmem [resolvable:$true] %s43_s15 }
  0x25   :  { %p303_p3 = scmp.lt.u32.totalorder %s299_s19, %s462_s3 }
  0x27   :  { %p305_p4 = pnand %p303_p3, %p300_p2 }
  0x29   :  { %308 = shalt.err (!%p305_p4)
}
  0x2a   :  { %s309_s24 = scalar_lea.vmem %s44_s15, 256  ;;  %p314_p6 = scmp.lt.s32.totalorder %s44_s15, %s44_s15 }
  0x2b   :  { %p310_p5 = scmp.ne.s32.totalorder %s44_s15, %s309_s24  ;;  %p315_p7 = scmp.lt.s32.totalorder %s309_s24, %s309_s24 }
  0x2d   :  { %p316_p8 = por %p315_p7, %p314_p6 }
  0x2f   :  { %p317_p9 = pnand %p316_p8, %p310_p5 }
  0x31   :  { %320 = shalt.err (!%p317_p9)
}
  0x32   :  { %49 = dma.hbm_to_vmem [thread:$0]  %s462_s3, 256, %s44_s15, [#allocation7], %s351_s27, %s351_s27, %s352_s28  }
  0x33   :  { %343 = dma.done.wait [#allocation4], 256  }
  0x34   :  { %344 = vsyncadd [#allocation4], 4294967040 }
  0x35   :  { %345 = dma.done.wait [#allocation7], 768  }
  0x36   :  { %346 = vsyncadd [#allocation7], 4294966528  ;;  %vm63_vm0 = vcmask 261120   ;;  %v354_v0 = vmov 0.0   ;;  %v70_v1 = vld [vmem:[#allocation6] sm:$0xff]  ;;  %v71_v2 = vld [vmem:[#allocation6 + $0x8] sm:$0xff] }
  0x37   :  { %65 = vst.msk [vmem:[#allocation2 + $0x8] sm:$0xff] %vm63_vm0, %v354_v0  ;;  %64 = vst.msk [vmem:[#allocation2] sm:$0xff] %vm63_vm0, %v354_v0  ;;  %v72_v3 = vld [vmem:[#allocation6 + $0x10] sm:$0xff]  ;;  %v232_v4 = vpack.c.bf16 %v71_v2, %v70_v1  ;;  %v73_v5 = vld [vmem:[#allocation6 + $0x18] sm:$0xff]  ;;  %s355_s26 = smov [#allocation9]  }
  0x38   :  { %v68_v6 = vld [vmem:[#allocation3] sm:$0xff]  ;;  %v236_v7 = vpack.c.bf16 %v73_v5, %v72_v3  ;;  %v69_v8 = vld [vmem:[#allocation3 + $0x8] sm:$0xff]  ;;  %v212_v15 = vld [vmem:[%s461_s2] ss:$0 sm:$0xff]  ;;  %s197_s29 = sshll.u32 %s355_s26, 4  ;;  %s198_s29 = int_to_ptr.vmem [resolvable:$true] %s197_s29 }
  0x39   :  { %229 = vmatprep.mubr.msk.f32.mxu0 %vm63_vm0, %v68_v6  ;;  %233 = vmatprep.subr.bf16.mxu0 %v232_v4  ;;  %v187_v26 = vld [vmem:[#allocation8 + $0x8] sm:$0xff]  ;;  %v186_v27 = vld [vmem:[#allocation8] sm:$0xff]  ;;  %s321_s2 = scalar_lea.vmem %s198_s29, 256  ;;  %p326_p11 = scmp.lt.s32.totalorder %s198_s29, %s198_s29 }
  0x3a   :  { %235 = vmatpush3.bf16.msra.mxu0 %v232_v4  ;;  %p322_p10 = scmp.ne.s32.totalorder %s198_s29, %s321_s2  ;;  %p327_p12 = scmp.lt.s32.totalorder %s321_s2, %s321_s2 }
  0x3b   :  { %237 = vmatprep.subr.bf16.mxu0 %v236_v7 }
  0x3c   :  { %p328_p13 = por %p327_p12, %p326_p11 }
  0x3e   :  { %239 = vmatpush3.bf16.msra.mxu0 %v236_v7  ;;  %v67_v9 = vld [vmem:[#allocation2 + $0x8] sm:$0xff]  ;;  %v66_v10 = vld [vmem:[#allocation2] sm:$0xff]  ;;  %p329_p0 = pnand %p328_p13, %p322_p10 }
  0x41   :  { %230 = vmatmul.mubr.msk.f32.vlgmr.msra.gmra.mrb[0].mxu0 %vm63_vm0, %v69_v8 }
 0x114   :  { %v231_v11 = vpop.f32.mrb[0].mxu0 }
 0x115   :  { %v157_v12 = vadd.f32 %v231_v11, %v67_v9  ;;  %v147_v13 = vpop.f32.mrb[1].mxu0 }
 0x116   :  { %v156_v14 = vadd.f32 %v147_v13, %v66_v10 }
 0x117   :  { %159 = vst.msk [vmem:[#allocation2 + $0x8] sm:$0xff] %vm63_vm0, %v157_v12 }
 0x118   :  { %158 = vst.msk [vmem:[#allocation2] sm:$0xff] %vm63_vm0, %v156_v14 }
 0x11e   :  { %v164_v16 = vld [vmem:[#allocation2 + $0x8] sm:$0xff] }
 0x11f   :  { %v163_v17 = vld [vmem:[#allocation2] sm:$0xff]  ;;  %v173_v18 = vadd.f32 %v212_v15, %v164_v16 }
 0x120   :  { %v172_v19 = vadd.f32 %v212_v15, %v163_v17 }
 0x121   :  { %v214_v20 = vmul.f32 -1.442695, %v173_v18 }
 0x122   :  { %v213_v21 = vmul.f32 -1.442695, %v172_v19 }
 0x123   :  { %247 = vpow2.f32 %v214_v20 }
 0x124   :  { %249 = vpow2.f32 %v213_v21 }
 0x12d   :  { %v248_v22 = vpop.eup %247 }
 0x12e   :  { %v250_v23 = vpop.eup %249  ;;  %v181_v24 = vadd.f32 1.0, %v248_v22 }
 0x12f   :  { %v180_v25 = vadd.f32 1.0, %v250_v23 }
 0x130   :  { %251 = vrcp.f32 %v181_v24 }
 0x131   :  { %253 = vrcp.f32 %v180_v25 }
 0x13a   :  { %v252_v28 = vpop.eup %251 }
 0x13b   :  { %v254_v29 = vpop.eup %253  ;;  %v189_v30 = vmul.f32 %v252_v28, %v187_v26 }
 0x13c   :  { %v188_v31 = vmul.f32 %v254_v29, %v186_v27 }
 0x13d   :  { %191 = vst.msk [vmem:[#allocation9 + $0x8] sm:$0xff] %vm63_vm0, %v189_v30 }
 0x13e   :  { %190 = vst.msk [vmem:[#allocation9] sm:$0xff] %vm63_vm0, %v188_v31 }
 0x13f   :  { %332 = shalt.err (!%p329_p0)
}
 0x140   :  { %s333_s6 = scalar_lea.hbm %s463_s4, 256 }
 0x141   :  { %p334_p1 = scmp.ne.s32.totalorder %s463_s4, %s333_s6  ;;  %p337_p2 = scmp.lt.u32.totalorder %s333_s6, %s463_s4 }
 0x143   :  { %p339_p3 = pnand %p337_p2, %p334_p1 }
 0x145   :  { %342 = shalt.err (!%p339_p3)
}
 0x146   :  { %203 = dma.vmem_to_hbm [thread:$0]  %s198_s29, 256, %s463_s4, [#allocation5], %s351_s27, %s351_s27, %s352_s28  }
 0x147   :  { %347 = dma.done.wait [#allocation5], 256  }
 0x148   :  { %348 = vsyncadd [#allocation5], 4294967040 }
 0x149   :  { %207 = vsyncpa [#allocation4], 1 }
 0x14a   :  { %208 = vsyncpa [#allocation7], 1 }
 0x14b   :  { %209 = vsyncpa [#allocation5], 1 }

</bundles_post_ra>
